<compile_context>
chip_gen: v6e
topology: v6e:2x2x1
jax: 0.10.0
libtpu: 0.0.40
codegen_flags: <defaults>
</compile_context>

<pallas_src>
import jax
import jax.numpy as jnp
from jax import lax
from jax.experimental import pallas as pl
from jax.experimental.pallas import tpu as pltpu


def _round_up(v, m):
    return ((v + m - 1) // m) * m


def _vmem_limit_bytes():
    """Generation-aware VMEM limit: ~7/8 of physical capacity, fallback to 32 MiB."""
    try:
        cap = pltpu.get_tpu_info().vmem_capacity_bytes
        return int(cap * 7 // 8)
    except Exception:
        return 32 * 1024 * 1024


def _fused_kernel(a_ref,                     # VMEM bf16 (N_pad, N_pad) normalized adjacency
                  x_ref,                     # VMEM bf16 (N_pad, F_pad)
                  w1_ref, w2_ref, w3_ref,    # VMEM bf16 (F_pad,128), (128,128), (128,128)
                  c_ref,                     # VMEM f32  (8,128): b1,b2,b3,wc_start,wc_end
                  scores_ref):               # VMEM f32  (N_pad, 128) output
    c = c_ref[...]
    b1, b2, b3 = c[0:1, :], c[1:2, :], c[2:3, :]
    wcs, wce = c[3:4, :], c[4:5, :]

    a = a_ref[...]                           # reused by all three aggregations

    # ---- GCNConv 1 (+ReLU): aggregate first, F << 128 ----
    ax = jnp.dot(a, x_ref[...], preferred_element_type=jnp.float32)
    h = jnp.dot(ax.astype(jnp.bfloat16), w1_ref[...],
                preferred_element_type=jnp.float32)
    h = jnp.maximum(h + b1, 0.0)

    # ---- GCNConv 2 (+ReLU): transform first (out <= in) ----
    hw = jnp.dot(h.astype(jnp.bfloat16), w2_ref[...],
                 preferred_element_type=jnp.float32)
    h = jnp.dot(a, hw.astype(jnp.bfloat16), preferred_element_type=jnp.float32)
    h = jnp.maximum(h + b2, 0.0)

    # ---- GCNConv 3 (+ReLU) ----
    hw = jnp.dot(h.astype(jnp.bfloat16), w3_ref[...],
                 preferred_element_type=jnp.float32)
    h = jnp.dot(a, hw.astype(jnp.bfloat16), preferred_element_type=jnp.float32)
    h = jnp.maximum(h + b3, 0.0)

    # ---- Edge head (separable): per-node partial scores on VPU/XLU (f32), packed
    # lane-dense into one (N_pad,128) slab: lane 0 = wc_start.h[v], lane 1 = wc_end.h[v].
    ss = jnp.sum(h * wcs, axis=-1, keepdims=True)        # (N_pad, 1) f32
    se = jnp.sum(h * wce, axis=-1, keepdims=True)        # (N_pad, 1) f32
    lane = lax.broadcasted_iota(jnp.int32, scores_ref.shape, 1)
    scores_ref[...] = jnp.where(lane == 0, ss, jnp.where(lane == 1, se, 0.0))


def gcn_normalize(edge_index, num_nodes):
    """Dense A_hat = D^-1/2 (A + I) D^-1/2 matching torch_geometric gcn_norm.

    Note: duplicate/self-loop edges are collapsed to a single unit self-loop
    (add_remaining_self_loops semantics for the unweighted case).
    """
    src, tgt = edge_index[0], edge_index[1]
    not_loop = (src != tgt).astype(jnp.float32)
    a = jnp.zeros((num_nodes, num_nodes), jnp.float32).at[tgt, src].add(not_loop)
    a = a + jnp.eye(num_nodes, dtype=jnp.float32)
    deg = a.sum(axis=1)
    d_inv_sqrt = jnp.where(deg > 0, lax.rsqrt(deg), 0.0)
    return d_inv_sqrt[:, None] * a * d_inv_sqrt[None, :]


def modified_edge_classifier_forward(params, x, edge_index):
    n, f = x.shape

    n_pad = _round_up(max(n, 8), 128)   # lane/sublane-dense graph dimension
    f_pad = _round_up(f, 128)

    a_hat = gcn_normalize(edge_index, n)

    # Zero-pad everything to lane-dense shapes; matmul operands in bf16.
    a_p = jnp.zeros((n_pad, n_pad), jnp.bfloat16).at[:n, :n].set(
        a_hat.astype(jnp.bfloat16))
    x_p = jnp.zeros((n_pad, f_pad), jnp.bfloat16).at[:n, :f].set(
        x.astype(jnp.bfloat16))
    w1_p = jnp.zeros((f_pad, 128), jnp.bfloat16).at[:f, :].set(
        params["w1"].astype(jnp.bfloat16))
    w2_p = jnp.zeros((128, 128), jnp.bfloat16).at[:, :64].set(
        params["w2"].astype(jnp.bfloat16))
    w3_p = jnp.zeros((128, 128), jnp.bfloat16).at[:64, :32].set(
        params["w3"].astype(jnp.bfloat16))

    # Small f32 constants packed into a single (8,128) tile (biases + classifier halves).
    consts = jnp.zeros((8, 128), jnp.float32)
    consts = consts.at[0, :128].set(params["b1"])
    consts = consts.at[1, :64].set(params["b2"])
    consts = consts.at[2, :32].set(params["b3"])
    consts = consts.at[3, :32].set(params["wc"][0, :32])
    consts = consts.at[4, :32].set(params["wc"][0, 32:64])

    flops = (2 * n_pad * n_pad * f_pad           # A @ X
             + 2 * n_pad * f_pad * 128           # (AX) @ W1
             + 2 * (2 * n_pad * 128 * 128)       # H @ W2, H @ W3
             + 2 * (2 * n_pad * n_pad * 128)     # A @ (HW2), A @ (HW3)
             + 4 * n_pad * 128)                  # edge head partial scores
    bytes_accessed = (2 * (a_p.size + x_p.size + w1_p.size + w2_p.size + w3_p.size)
                      + 4 * consts.size
                      + 4 * n_pad * 128)

    # No grid: whole-array VMEM residency, single-buffered (the dense adjacency is the
    # dominant operand; double-buffering it buys nothing with a single invocation).
    vmem_spec = pl.BlockSpec(memory_space=pltpu.MemorySpace.VMEM)

    scores = pl.pallas_call(
        _fused_kernel,
        out_shape=jax.ShapeDtypeStruct((n_pad, 128), jnp.float32),
        in_specs=[vmem_spec] * 6,
        out_specs=vmem_spec,
        compiler_params=pltpu.CompilerParams(
            vmem_limit_bytes=_vmem_limit_bytes()),
        cost_estimate=pl.CostEstimate(
            flops=int(flops), transcendentals=0, bytes_accessed=int(bytes_accessed)),
    )(a_p, x_p, w1_p, w2_p, w3_p, consts)

    # O(E) gather/add of the per-node partial scores stays in XLA (cheap; avoids the
    # serial in-kernel per-edge loop and 512 B/edge HBM writeback).
    start = edge_index[0].astype(jnp.int32)
    end = edge_index[1].astype(jnp.int32)
    logits = scores[start, 0] + scores[end, 1] + params["bc"]
    return logits[:, None]


def reference_forward(params, x, edge_index):
    """Pure-JAX f32 reference (same math as the PyTorch module at inference)."""
    a_hat = gcn_normalize(edge_index, x.shape[0])
    h = jnp.maximum(a_hat @ (x @ params["w1"]) + params["b1"], 0.0)
    h = jnp.maximum(a_hat @ (h @ params["w2"]) + params["b2"], 0.0)
    h = jnp.maximum(a_hat @ (h @ params["w3"]) + params["b3"], 0.0)
    start, end = edge_index[0], edge_index[1]
    feat = jnp.concatenate([h[start], h[end]], axis=1)
    return feat @ params["wc"].T + params["bc"]


def init_params(key, num_features):
    ks = jax.random.split(key, 4)

    def glorot(k, shape):
        fan_in, fan_out = shape
        lim = jnp.sqrt(6.0 / (fan_in + fan_out))
        return jax.random.uniform(k, shape, jnp.float32, -lim, lim)

    return {
        "w1": glorot(ks[0], (num_features, 128)),
        "b1": jnp.zeros((128,), jnp.float32),
        "w2": glorot(ks[1], (128, 64)),
        "b2": jnp.zeros((64,), jnp.float32),
        "w3": glorot(ks[2], (64, 32)),
        "b3": jnp.zeros((32,), jnp.float32),
        "wc": glorot(ks[3], (1, 64)),      # torch.nn.Linear(2*32, 1).weight
        "bc": jnp.zeros((1,), jnp.float32),
    }


if __name__ == "__main__":
    key = jax.random.PRNGKey(0)
    k_x, k_e, k_p = jax.random.split(key, 3)

    num_nodes = 16
    num_features = 8
    num_edges = 32

    x = jax.random.normal(k_x, (num_nodes, num_features), jnp.float32)
    edge_index = jax.random.randint(k_e, (2, num_edges), 0, num_nodes, dtype=jnp.int32)

    params = init_params(k_p, num_features)

    out = modified_edge_classifier_forward(params, x, edge_index)
    out = jax.block_until_ready(out)
    assert out.shape == (num_edges, 1), out.shape
    assert out.dtype == jnp.float32

    ref = reference_forward(params, x, edge_index)
    max_err = float(jnp.max(jnp.abs(out - ref)))
    assert jnp.allclose(out, ref, atol=5e-2, rtol=5e-2), f"max_err={max_err}"

    print("KERNEL_OK")
</pallas_src>

<mosaic_0001>
module attributes {stable_mosaic.version = 11 : i64} {
  func.func @_fused_kernel(%arg0: memref<128x128xbf16, #tpu.memory_space<vmem>>, %arg1: memref<128x128xbf16, #tpu.memory_space<vmem>>, %arg2: memref<128x128xbf16, #tpu.memory_space<vmem>>, %arg3: memref<128x128xbf16, #tpu.memory_space<vmem>>, %arg4: memref<128x128xbf16, #tpu.memory_space<vmem>>, %arg5: memref<8x128xf32, #tpu.memory_space<vmem>>, %arg6: memref<128x128xf32, #tpu.memory_space<vmem>>) attributes {dimension_semantics = [], scalar_prefetch = 0 : i64, scratch_operands = 0 : i64, tpu.core_type = #tpu.core_type<tc>} {
    %c0 = arith.constant 0 : index
    %c0_0 = arith.constant 0 : index
    %0 = vector.load %arg5[%c0, %c0_0] : memref<8x128xf32, #tpu.memory_space<vmem>>, vector<8x128xf32>
    %1 = vector.extract_strided_slice %0 {offsets = [0, 0], sizes = [1, 128], strides = [1, 1]} : vector<8x128xf32> to vector<1x128xf32>
    %2 = vector.extract_strided_slice %0 {offsets = [1, 0], sizes = [1, 128], strides = [1, 1]} : vector<8x128xf32> to vector<1x128xf32>
    %3 = vector.extract_strided_slice %0 {offsets = [2, 0], sizes = [1, 128], strides = [1, 1]} : vector<8x128xf32> to vector<1x128xf32>
    %4 = vector.extract_strided_slice %0 {offsets = [3, 0], sizes = [1, 128], strides = [1, 1]} : vector<8x128xf32> to vector<1x128xf32>
    %5 = vector.extract_strided_slice %0 {offsets = [4, 0], sizes = [1, 128], strides = [1, 1]} : vector<8x128xf32> to vector<1x128xf32>
    %c0_1 = arith.constant 0 : index
    %c0_2 = arith.constant 0 : index
    %6 = vector.load %arg0[%c0_1, %c0_2] : memref<128x128xbf16, #tpu.memory_space<vmem>>, vector<128x128xbf16>
    %c0_3 = arith.constant 0 : index
    %c0_4 = arith.constant 0 : index
    %7 = vector.load %arg1[%c0_3, %c0_4] : memref<128x128xbf16, #tpu.memory_space<vmem>>, vector<128x128xbf16>
    %cst = arith.constant dense<0.000000e+00> : vector<128x128xf32>
    %8 = tpu.matmul %6, %7, %cst {dimension_numbers = #tpu.dot_dimension_numbers<[1], [0], [0], [1], [0, 0, 1, 1], [], []>} : vector<128x128xbf16>, vector<128x128xbf16>, vector<128x128xf32> -> vector<128x128xf32>
    %9 = arith.truncf %8 : vector<128x128xf32> to vector<128x128xbf16>
    %c0_5 = arith.constant 0 : index
    %c0_6 = arith.constant 0 : index
    %10 = vector.load %arg2[%c0_5, %c0_6] : memref<128x128xbf16, #tpu.memory_space<vmem>>, vector<128x128xbf16>
    %cst_7 = arith.constant dense<0.000000e+00> : vector<128x128xf32>
    %11 = tpu.matmul %9, %10, %cst_7 {dimension_numbers = #tpu.dot_dimension_numbers<[1], [0], [0], [1], [0, 0, 1, 1], [], []>} : vector<128x128xbf16>, vector<128x128xbf16>, vector<128x128xf32> -> vector<128x128xf32>
    %12 = vector.broadcast %1 : vector<1x128xf32> to vector<128x128xf32>
    %13 = arith.addf %11, %12 : vector<128x128xf32>
    %cst_8 = arith.constant 0.000000e+00 : f32
    %14 = vector.broadcast %cst_8 : f32 to vector<128x128xf32>
    %15 = arith.maximumf %13, %14 : vector<128x128xf32>
    %16 = arith.truncf %15 : vector<128x128xf32> to vector<128x128xbf16>
    %c0_9 = arith.constant 0 : index
    %c0_10 = arith.constant 0 : index
    %17 = vector.load %arg3[%c0_9, %c0_10] : memref<128x128xbf16, #tpu.memory_space<vmem>>, vector<128x128xbf16>
    %cst_11 = arith.constant dense<0.000000e+00> : vector<128x128xf32>
    %18 = tpu.matmul %16, %17, %cst_11 {dimension_numbers = #tpu.dot_dimension_numbers<[1], [0], [0], [1], [0, 0, 1, 1], [], []>} : vector<128x128xbf16>, vector<128x128xbf16>, vector<128x128xf32> -> vector<128x128xf32>
    %19 = arith.truncf %18 : vector<128x128xf32> to vector<128x128xbf16>
    %cst_12 = arith.constant dense<0.000000e+00> : vector<128x128xf32>
    %20 = tpu.matmul %6, %19, %cst_12 {dimension_numbers = #tpu.dot_dimension_numbers<[1], [0], [0], [1], [0, 0, 1, 1], [], []>} : vector<128x128xbf16>, vector<128x128xbf16>, vector<128x128xf32> -> vector<128x128xf32>
    %21 = vector.broadcast %2 : vector<1x128xf32> to vector<128x128xf32>
    %22 = arith.addf %20, %21 : vector<128x128xf32>
    %cst_13 = arith.constant 0.000000e+00 : f32
    %23 = vector.broadcast %cst_13 : f32 to vector<128x128xf32>
    %24 = arith.maximumf %22, %23 : vector<128x128xf32>
    %25 = arith.truncf %24 : vector<128x128xf32> to vector<128x128xbf16>
    %c0_14 = arith.constant 0 : index
    %c0_15 = arith.constant 0 : index
    %26 = vector.load %arg4[%c0_14, %c0_15] : memref<128x128xbf16, #tpu.memory_space<vmem>>, vector<128x128xbf16>
    %cst_16 = arith.constant dense<0.000000e+00> : vector<128x128xf32>
    %27 = tpu.matmul %25, %26, %cst_16 {dimension_numbers = #tpu.dot_dimension_numbers<[1], [0], [0], [1], [0, 0, 1, 1], [], []>} : vector<128x128xbf16>, vector<128x128xbf16>, vector<128x128xf32> -> vector<128x128xf32>
    %28 = arith.truncf %27 : vector<128x128xf32> to vector<128x128xbf16>
    %cst_17 = arith.constant dense<0.000000e+00> : vector<128x128xf32>
    %29 = tpu.matmul %6, %28, %cst_17 {dimension_numbers = #tpu.dot_dimension_numbers<[1], [0], [0], [1], [0, 0, 1, 1], [], []>} : vector<128x128xbf16>, vector<128x128xbf16>, vector<128x128xf32> -> vector<128x128xf32>
    %30 = vector.broadcast %3 : vector<1x128xf32> to vector<128x128xf32>
    %31 = arith.addf %29, %30 : vector<128x128xf32>
    %cst_18 = arith.constant 0.000000e+00 : f32
    %32 = vector.broadcast %cst_18 : f32 to vector<128x128xf32>
    %33 = arith.maximumf %31, %32 : vector<128x128xf32>
    %34 = vector.broadcast %4 : vector<1x128xf32> to vector<128x128xf32>
    %35 = arith.mulf %33, %34 : vector<128x128xf32>
    %cst_19 = arith.constant dense<0.000000e+00> : vector<128xf32>
    %36 = vector.multi_reduction <add>, %35, %cst_19 [1] : vector<128x128xf32> to vector<128xf32>
    %37 = vector.shape_cast %36 : vector<128xf32> to vector<128x1xf32>
    %38 = vector.broadcast %5 : vector<1x128xf32> to vector<128x128xf32>
    %39 = arith.mulf %33, %38 : vector<128x128xf32>
    %cst_20 = arith.constant dense<0.000000e+00> : vector<128xf32>
    %40 = vector.multi_reduction <add>, %39, %cst_20 [1] : vector<128x128xf32> to vector<128xf32>
    %41 = vector.shape_cast %40 : vector<128xf32> to vector<128x1xf32>
    %42 = tpu.iota {dimensions = array<i32: 1>} : vector<128x128xi32>
    %c0_i32 = arith.constant 0 : i32
    %43 = vector.broadcast %c0_i32 : i32 to vector<128x128xi32>
    %44 = arith.cmpi eq, %42, %43 : vector<128x128xi32>
    %c1_i32 = arith.constant 1 : i32
    %45 = vector.broadcast %c1_i32 : i32 to vector<128x128xi32>
    %46 = arith.cmpi eq, %42, %45 : vector<128x128xi32>
    %cst_21 = arith.constant 0.000000e+00 : f32
    %47 = vector.shape_cast %41 : vector<128x1xf32> to vector<128x1xf32>
    %48 = vector.broadcast %47 : vector<128x1xf32> to vector<128x128xf32>
    %49 = vector.broadcast %cst_21 : f32 to vector<128x128xf32>
    %50 = arith.select %46, %48, %49 : vector<128x128xi1>, vector<128x128xf32>
    %51 = vector.shape_cast %37 : vector<128x1xf32> to vector<128x1xf32>
    %52 = vector.broadcast %51 : vector<128x1xf32> to vector<128x128xf32>
    %53 = arith.select %44, %52, %50 : vector<128x128xi1>, vector<128x128xf32>
    %c0_22 = arith.constant 0 : index
    %c0_23 = arith.constant 0 : index
    %54 = vector.load %arg6[%c0_22, %c0_23] : memref<128x128xf32, #tpu.memory_space<vmem>>, vector<128x128xf32>
    tpu.vector_store %arg6[%c0_22, %c0_23], %53 {strides = array<i32>} : memref<128x128xf32, #tpu.memory_space<vmem>>, vector<128x128xf32>,
    return
  }
}

</mosaic_0001>

<bundles_post_ra>
// kernel: tpu_custom_call.1
= control target key start
LH: loop header
LB: loop body
LE: loop exit
PB: predicated region body
PF: predicated region fallthrough
CT: control target
= control target key end

     0   :  { %11 = vsyncpa [#allocation3], 0  ;;  %s2036_s0 = inlined_call_operand.hbm [shape: bf16[128,128], index: 0, kind: input, shape index: {}]   ;;  %s2037_s1 = inlined_call_operand.hbm [shape: bf16[128,128], index: 1, kind: input, shape index: {}]   ;;  %s2038_s2 = inlined_call_operand.hbm [shape: bf16[128,128], index: 2, kind: input, shape index: {}]   ;;  %s2039_s3 = inlined_call_operand.hbm [shape: bf16[128,128], index: 3, kind: input, shape index: {}]   ;;  %s2040_s4 = inlined_call_operand.hbm [shape: bf16[128,128], index: 4, kind: input, shape index: {}]   ;;  %s2041_s5 = inlined_call_operand.vmem [shape: f32[8,128], index: 5, kind: input, shape index: {}]   ;;  %s2042_s6 = inlined_call_operand.hbm [shape: f32[128,128], index: 6, kind: output, shape index: {}]  }
   0x1   :  { %12 = vsyncpa [#allocation6], 0 }
   0x2   :  { %13 = vsyncpa [#allocation9], 0 }
   0x3   :  { %14 = vsyncpa [#allocation4], 0  ;;  %s1777_s21 = smov [#allocation5]   ;;  %s1778_s23 = smov [#allocation8]  }
   0x4   :  { %s32_s22 = sshll.u32 %s1777_s21, 4  ;;  %s56_s24 = sshll.u32 %s1778_s23, 4  ;;  %s33_s22 = int_to_ptr.vmem [resolvable:$true] %s32_s22  ;;  %s57_s24 = int_to_ptr.vmem [resolvable:$true] %s56_s24 }
   0x5   :  { %s1657_s25 = scalar_lea.vmem %s33_s22, 1024  ;;  %p1662_p1 = scmp.lt.s32.totalorder %s33_s22, %s33_s22 }
   0x6   :  { %p1658_p0 = scmp.ne.s32.totalorder %s33_s22, %s1657_s25  ;;  %p1663_p2 = scmp.lt.s32.totalorder %s1657_s25, %s1657_s25 }
   0x8   :  { %p1664_p3 = por %p1663_p2, %p1662_p1 }
   0xa   :  { %p1665_p4 = pnand %p1664_p3, %p1658_p0 }
   0xc   :  { %1668 = shalt.err (!%p1665_p4)
}
   0xd   :  { %s1779_s26 = smov 64   ;;  %s1780_s27 = smov 4  }
   0xe   :  { %38 = dma.hbm_to_vmem [thread:$0]  %s2037_s1, 1024, %s33_s22, [#allocation6], %s1779_s26, %s1779_s26, %s1780_s27  }
   0xf   :  { %s1677_s30 = scalar_lea.vmem %s57_s24, 1024  ;;  %p1682_p6 = scmp.lt.s32.totalorder %s57_s24, %s57_s24 }
  0x10   :  { %p1678_p5 = scmp.ne.s32.totalorder %s57_s24, %s1677_s30  ;;  %p1683_p7 = scmp.lt.s32.totalorder %s1677_s30, %s1677_s30 }
  0x12   :  { %p1684_p8 = por %p1683_p7, %p1682_p6 }
  0x14   :  { %p1685_p9 = pnand %p1684_p8, %p1678_p5 }
  0x16   :  { %1688 = shalt.err (!%p1685_p9)
}
  0x17   :  { %62 = dma.hbm_to_vmem [thread:$0]  %s2039_s3, 1024, %s57_s24, [#allocation9], %s1779_s26, %s1779_s26, %s1780_s27  }
  0x18   :  { %s1781_s9 = smov [#allocation2]   ;;  %s1782_s11 = smov [#allocation7]  }
  0x19   :  { %s20_s10 = sshll.u32 %s1781_s9, 4  ;;  %s44_s12 = sshll.u32 %s1782_s11, 4  ;;  %s21_s10 = int_to_ptr.vmem [resolvable:$true] %s20_s10  ;;  %s45_s12 = int_to_ptr.vmem [resolvable:$true] %s44_s12 }
  0x1a   :  { %s1697_s1 = scalar_lea.vmem %s21_s10, 1024  ;;  %p1702_p11 = scmp.lt.s32.totalorder %s21_s10, %s21_s10 }
  0x1b   :  { %p1698_p10 = scmp.ne.s32.totalorder %s21_s10, %s1697_s1  ;;  %p1703_p12 = scmp.lt.s32.totalorder %s1697_s1, %s1697_s1 }
  0x1d   :  { %p1704_p13 = por %p1703_p12, %p1702_p11 }
  0x1f   :  { %p1705_p0 = pnand %p1704_p13, %p1698_p10 }
  0x21   :  { %1708 = shalt.err (!%p1705_p0)
}
  0x22   :  { %26 = dma.hbm_to_vmem [thread:$0]  %s2036_s0, 1024, %s21_s10, [#allocation3], %s1779_s26, %s1779_s26, %s1780_s27  }
  0x23   :  { %s1717_s3 = scalar_lea.vmem %s45_s12, 1024  ;;  %p1722_p2 = scmp.lt.s32.totalorder %s45_s12, %s45_s12 }
  0x24   :  { %p1718_p1 = scmp.ne.s32.totalorder %s45_s12, %s1717_s3  ;;  %p1723_p3 = scmp.lt.s32.totalorder %s1717_s3, %s1717_s3 }
  0x26   :  { %p1724_p4 = por %p1723_p3, %p1722_p2 }
  0x28   :  { %p1725_p5 = pnand %p1724_p4, %p1718_p1 }
  0x2a   :  { %1728 = shalt.err (!%p1725_p5)
}
  0x2b   :  { %50 = dma.hbm_to_vmem [thread:$0]  %s2038_s2, 1024, %s45_s12, [#allocation6], %s1779_s26, %s1779_s26, %s1780_s27  }
  0x2c   :  { %s1783_s17 = smov [#allocation10]  }
  0x2d   :  { %s68_s18 = sshll.u32 %s1783_s17, 4  ;;  %s69_s18 = int_to_ptr.vmem [resolvable:$true] %s68_s18 }
  0x2e   :  { %s1737_s19 = scalar_lea.vmem %s69_s18, 1024  ;;  %p1742_p7 = scmp.lt.s32.totalorder %s69_s18, %s69_s18 }
  0x2f   :  { %p1738_p6 = scmp.ne.s32.totalorder %s69_s18, %s1737_s19  ;;  %p1743_p8 = scmp.lt.s32.totalorder %s1737_s19, %s1737_s19 }
  0x31   :  { %p1744_p9 = por %p1743_p8, %p1742_p7 }
  0x33   :  { %p1745_p10 = pnand %p1744_p9, %p1738_p6 }
  0x35   :  { %1748 = shalt.err (!%p1745_p10)
}
  0x36   :  { %74 = dma.hbm_to_vmem [thread:$0]  %s2040_s4, 1024, %s69_s18, [#allocation9], %s1779_s26, %s1779_s26, %s1780_s27  }
  0x37   :  { %1769 = dma.done.wait [#allocation3], 1024  }
  0x38   :  { %1770 = vsyncadd [#allocation3], 4294966272 }
  0x39   :  { %1771 = dma.done.wait [#allocation6], 2048  }
  0x3a   :  { %1772 = vsyncadd [#allocation6], 4294965248 }
  0x3b   :  { %1773 = dma.done.wait [#allocation9], 2048  }
  0x3c   :  { %1774 = vsyncadd [#allocation9], 4294965248  ;;  %v1609_v0 = vld [vmem:[#allocation5 + $0x38] sm:$0xff]   ;;  %v1610_v1 = vld [vmem:[#allocation5 + $0x30] sm:$0xff]   ;;  %v343_v56 = vlaneseq }
  0x3d   :  { %1407 = vmatprep.subr.bf16.mxu0 %v1609_v0  ;;  %v1611_v2 = vld [vmem:[#allocation5 + $0x28] sm:$0xff]   ;;  %v1612_v3 = vld [vmem:[#allocation5 + $0x20] sm:$0xff]   ;;  %v1613_v5 = vld [vmem:[#allocation5 + $0x18] sm:$0xff]  }
  0x3e   :  { %1408 = vmatpush3.bf16.msra.mxu0 %v1609_v0  ;;  %v1852_v4 = vld [vmem:[#allocation2] sm:$0xff]   ;;  %v1614_v6 = vld [vmem:[#allocation5 + $0x10] sm:$0xff]   ;;  %v1625_v7 = vld [vmem:[#allocation7 + $0x38] sm:$0xff]   ;;  %v1878_v57 = vshrl.u32 %v343_v56, 7 }
  0x3f   :  { %1409 = vmatprep.subr.bf16.mxu0 %v1610_v1  ;;  %1423 = vmatprep.mubr.bf16.mxu0 %v1852_v4  ;;  %v1626_v8 = vld [vmem:[#allocation7 + $0x30] sm:$0xff]   ;;  %v1615_v9 = vld [vmem:[#allocation5 + $0x8] sm:$0xff]   ;;  %v1616_v11 = vld [vmem:[#allocation5] sm:$0xff]  }
  0x40   :  { %1439 = vmatprep.subr.bf16.mxu1 %v1625_v7  ;;  %v1627_v10 = vld [vmem:[#allocation7 + $0x28] sm:$0xff]   ;;  %v1628_v12 = vld [vmem:[#allocation7 + $0x20] sm:$0xff]   ;;  %v1629_v13 = vld [vmem:[#allocation7 + $0x18] sm:$0xff]   ;;  %v345_v58 = vsub.s32 0, %v1878_v57 }
  0x41   :  { %1440 = vmatpush3.bf16.msra.mxu1 %v1625_v7  ;;  %v1855_v14 = vld [vmem:[#allocation2 + $0x8] sm:$0xff]   ;;  %v1857_v15 = vld [vmem:[#allocation2 + $0x10] sm:$0xff]   ;;  %v1861_v17 = vld [vmem:[#allocation2 + $0x18] sm:$0xff]  }
  0x42   :  { %1410 = vmatpush3.bf16.msra.mxu0 %v1610_v1  ;;  %1441 = vmatprep.subr.bf16.mxu1 %v1626_v8  ;;  %v1630_v16 = vld [vmem:[#allocation7 + $0x10] sm:$0xff]   ;;  %v1863_v18 = vld [vmem:[#allocation2 + $0x20] sm:$0xff]   ;;  %v1867_v19 = vld [vmem:[#allocation2 + $0x28] sm:$0xff]  }
  0x43   :  { %1411 = vmatprep.subr.bf16.mxu0 %v1611_v2  ;;  %v1869_v20 = vld [vmem:[#allocation2 + $0x30] sm:$0xff]   ;;  %v1873_v21 = vld [vmem:[#allocation2 + $0x38] sm:$0xff]   ;;  %v1631_v22 = vld [vmem:[#allocation7 + $0x8] sm:$0xff]  }
  0x44   :  { %v1632_v23 = vld [vmem:[#allocation7] sm:$0xff]   ;;  %v1633_v24 = vld [vmem:[#allocation8 + $0x38] sm:$0xff]   ;;  %v1634_v25 = vld [vmem:[#allocation8 + $0x30] sm:$0xff]  }
  0x45   :  { %1442 = vmatpush3.bf16.msra.mxu1 %v1626_v8  ;;  %v1635_v26 = vld [vmem:[#allocation8 + $0x28] sm:$0xff]   ;;  %v1636_v27 = vld [vmem:[#allocation8 + $0x20] sm:$0xff]   ;;  %v1637_v28 = vld [vmem:[#allocation8 + $0x18] sm:$0xff]  }
  0x46   :  { %1412 = vmatpush3.bf16.msra.mxu0 %v1611_v2  ;;  %1443 = vmatprep.subr.bf16.mxu1 %v1627_v10  ;;  %v1638_v53 = vld [vmem:[#allocation8 + $0x10] sm:$0xff]   ;;  %v1639_v54 = vld [vmem:[#allocation8 + $0x8] sm:$0xff]   ;;  %v1640_v55 = vld [vmem:[#allocation8] sm:$0xff]  }
  0x47   :  { %1413 = vmatprep.subr.bf16.mxu0 %v1612_v3  ;;  %v1884_v59 = vld [vmem:[%s2041_s5] sm:$0xff]  ;;  %s1784_s5 = smov [#allocation11]  }
  0x48   :  { %v346_v61 = vrot.slane %v1884_v59, %v345_v58  ;;  %s1257_s21 = sshll.u32 %s1784_s5, 4  ;;  %s1258_s21 = int_to_ptr.vmem [resolvable:$true] %s1257_s21 }
  0x49   :  { %1444 = vmatpush3.bf16.msra.mxu1 %v1627_v10  ;;  %s1749_s22 = scalar_lea.vmem %s1258_s21, 2048  ;;  %p1754_p12 = scmp.lt.s32.totalorder %s1258_s21, %s1258_s21 }
  0x4a   :  { %1414 = vmatpush3.bf16.msra.mxu0 %v1612_v3  ;;  %1445 = vmatprep.subr.bf16.mxu1 %v1628_v12  ;;  %p1750_p11 = scmp.ne.s32.totalorder %s1258_s21, %s1749_s22  ;;  %p1755_p13 = scmp.lt.s32.totalorder %s1749_s22, %s1749_s22 }
  0x4b   :  { %1415 = vmatprep.subr.bf16.mxu0 %v1613_v5 }
  0x4c   :  { %p1756_p0 = por %p1755_p13, %p1754_p12 }
  0x4d   :  { %1446 = vmatpush3.bf16.msra.mxu1 %v1628_v12 }
  0x4e   :  { %1416 = vmatpush3.bf16.msra.mxu0 %v1613_v5  ;;  %1447 = vmatprep.subr.bf16.mxu1 %v1629_v13  ;;  %p1757_p1 = pnand %p1756_p0, %p1750_p11 }
  0x4f   :  { %1417 = vmatprep.subr.bf16.mxu0 %v1614_v6 }
  0x51   :  { %1448 = vmatpush3.bf16.msra.mxu1 %v1629_v13 }
  0x52   :  { %1418 = vmatpush3.bf16.msra.mxu0 %v1614_v6  ;;  %1449 = vmatprep.subr.bf16.mxu1 %v1630_v16 }
  0x53   :  { %1419 = vmatprep.subr.bf16.mxu0 %v1615_v9 }
  0x55   :  { %1450 = vmatpush3.bf16.msra.mxu1 %v1630_v16 }
  0x56   :  { %1420 = vmatpush3.bf16.msra.mxu0 %v1615_v9  ;;  %1451 = vmatprep.subr.bf16.mxu1 %v1631_v22 }
  0x57   :  { %1421 = vmatprep.subr.bf16.mxu0 %v1616_v11 }
  0x59   :  { %1452 = vmatpush3.bf16.msra.mxu1 %v1631_v22 }
  0x5a   :  { %1422 = vmatpush3.bf16.msra.mxu0 %v1616_v11  ;;  %1453 = vmatprep.subr.bf16.mxu1 %v1632_v23 }
  0x5b   :  { %1471 = vmatprep.subr.bf16.mxu0 %v1633_v24 }
  0x5d   :  { %1424 = vmatmul.mubr.bf16.vlgmr.msra.gmra.mxu0 %v1855_v14  ;;  %1454 = vmatpush3.bf16.msra.mxu1 %v1632_v23 }
  0x5e   :  { %1427 = vmatprep.mubr.bf16.mxu0 %v1857_v15  ;;  %1472 = vmatpush3.bf16.msra.mxu0 %v1633_v24 }
  0x5f   :  { %1473 = vmatprep.subr.bf16.mxu0 %v1634_v25 }
  0x62   :  { %1474 = vmatpush3.bf16.msra.mxu0 %v1634_v25 }
  0x63   :  { %1475 = vmatprep.subr.bf16.mxu0 %v1635_v26 }
  0x65   :  { %1428 = vmatmul.mubr.bf16.gmra.mxu0 %v1861_v17 }
  0x66   :  { %1431 = vmatprep.mubr.bf16.mxu0 %v1863_v18  ;;  %1476 = vmatpush3.bf16.msra.mxu0 %v1635_v26 }
  0x67   :  { %1477 = vmatprep.subr.bf16.mxu0 %v1636_v27 }
  0x6a   :  { %1478 = vmatpush3.bf16.msra.mxu0 %v1636_v27 }
  0x6b   :  { %1479 = vmatprep.subr.bf16.mxu0 %v1637_v28 }
  0x6d   :  { %1432 = vmatmul.mubr.bf16.gmra.mxu0 %v1867_v19 }
  0x6e   :  { %1435 = vmatprep.mubr.bf16.mxu0 %v1869_v20  ;;  %1480 = vmatpush3.bf16.msra.mxu0 %v1637_v28 }
  0x6f   :  { %1481 = vmatprep.subr.bf16.mxu0 %v1638_v53 }
  0x72   :  { %1482 = vmatpush3.bf16.msra.mxu0 %v1638_v53 }
  0x73   :  { %1483 = vmatprep.subr.bf16.mxu0 %v1639_v54 }
  0x75   :  { %1436 = vmatmul.mubr.bf16.gmra.mxu0 %v1873_v21 }
  0x76   :  { %1484 = vmatpush3.bf16.msra.mxu0 %v1639_v54 }
  0x77   :  { %1485 = vmatprep.subr.bf16.mxu0 %v1640_v55 }
  0x7a   :  { %1486 = vmatpush3.bf16.msra.mxu0 %v1640_v55 }
 0x11d   :  { %v1425_v29 = vpop.f32.mrf.mxu0 }
 0x11f   :  { %v256_v30 = vpop.f32.mrf.mxu0 }
 0x121   :  { %v1426_v31 = vpop.f32.mrf.mxu0 }
 0x122   :  { %v320_v34 = vpack.c.bf16 %v1426_v31, %v1425_v29 }
 0x123   :  { %v259_v32 = vpop.f32.mrf.mxu0 }
 0x124   :  { %v319_v33 = vpack.c.bf16 %v259_v32, %v256_v30 }
 0x125   :  { %v1429_v35 = vpop.f32.mrf.mxu0 }
 0x126   :  { %1455 = vmatprep.mubr.bf16.mxu1 %v319_v33 }
 0x127   :  { %v272_v36 = vpop.f32.mrf.mxu0  ;;  %1456 = vmatmul.mubr.bf16.vlgmr.msra.gmra.mxu1 %v320_v34 }
 0x129   :  { %v1430_v37 = vpop.f32.mrf.mxu0 }
 0x12a   :  { %v322_v40 = vpack.c.bf16 %v1430_v37, %v1429_v35 }
 0x12b   :  { %v275_v38 = vpop.f32.mrf.mxu0 }
 0x12c   :  { %v321_v39 = vpack.c.bf16 %v275_v38, %v272_v36 }
 0x12d   :  { %v1433_v41 = vpop.f32.mrf.mxu0 }
 0x12e   :  { %1459 = vmatprep.mubr.bf16.mxu1 %v321_v39 }
 0x12f   :  { %v288_v42 = vpop.f32.mrf.mxu0  ;;  %1460 = vmatmul.mubr.bf16.gmra.mxu1 %v322_v40 }
 0x131   :  { %v1434_v43 = vpop.f32.mrf.mxu0 }
 0x132   :  { %v324_v46 = vpack.c.bf16 %v1434_v43, %v1433_v41 }
 0x133   :  { %v291_v44 = vpop.f32.mrf.mxu0 }
 0x134   :  { %v323_v45 = vpack.c.bf16 %v291_v44, %v288_v42 }
 0x135   :  { %v1437_v47 = vpop.f32.mrf.mxu0 }
 0x136   :  { %1463 = vmatprep.mubr.bf16.mxu1 %v323_v45 }
 0x137   :  { %v304_v48 = vpop.f32.mrf.mxu0  ;;  %1464 = vmatmul.mubr.bf16.gmra.mxu1 %v324_v46 }
 0x139   :  { %v1438_v49 = vpop.f32.mrf.mxu0 }
 0x13a   :  { %v326_v52 = vpack.c.bf16 %v1438_v49, %v1437_v47 }
 0x13b   :  { %v307_v50 = vpop.f32.mrf.mxu0 }
 0x13c   :  { %v325_v51 = vpack.c.bf16 %v307_v50, %v304_v48 }
 0x13e   :  { %1467 = vmatprep.mubr.bf16.mxu1 %v325_v51 }
 0x13f   :  { %1468 = vmatmul.mubr.bf16.gmra.mxu1 %v326_v52 }
 0x140   :  { %1519 = vmatprep.mubr.bf16.mxu1 %v1852_v4 }
 0x1e7   :  { %v1457_v60 = vpop.f32.mrf.mxu1 }
 0x1e8   :  { %v438_v2 = vadd.f32 %v1457_v60, %v346_v61 }
 0x1e9   :  { %v429_v62 = vpop.f32.mrf.mxu1 }
 0x1ea   :  { %v430_v0 = vadd.f32 %v429_v62, %v346_v61  ;;  %v494_v10 = vmax.f32 %v438_v2, 0.0  ;;  %v1642_v2 = vld [vmem:[#allocation10 + $0x30] sm:$0xff]  }
 0x1eb   :  { %v1458_v63 = vpop.f32.mrf.mxu1 }
 0x1ec   :  { %v441_v1 = vadd.f32 %v1458_v63, %v346_v61  ;;  %v492_v8 = vmax.f32 %v430_v0, 0.0 }
 0x1ed   :  { %v432_v3 = vpop.f32.mrf.mxu1 }
 0x1ee   :  { %v433_v5 = vadd.f32 %v432_v3, %v346_v61  ;;  %v495_v6 = vmax.f32 %v441_v1, 0.0  ;;  %v1641_v1 = vld [vmem:[#allocation10 + $0x38] sm:$0xff]   ;;  %v1643_v3 = vld [vmem:[#allocation10 + $0x28] sm:$0xff]  }
 0x1ef   :  { %v1461_v7 = vpop.f32.mrf.mxu1  ;;  %1535 = vmatprep.subr.bf16.mxu0 %v1641_v1 }
 0x1f0   :  { %v493_v9 = vmax.f32 %v433_v5, 0.0  ;;  %v509_v13 = vpack.c.bf16 %v495_v6, %v494_v10  ;;  %v454_v24 = vadd.f32 %v1461_v7, %v346_v61  ;;  %v1644_v5 = vld [vmem:[#allocation10 + $0x20] sm:$0xff]  }
 0x1f1   :  { %v445_v11 = vpop.f32.mrf.mxu1 }
 0x1f2   :  { %v508_v12 = vpack.c.bf16 %v493_v9, %v492_v8  ;;  %v446_v22 = vadd.f32 %v445_v11, %v346_v61  ;;  %v498_v31 = vmax.f32 %v454_v24, 0.0 }
 0x1f3   :  { %v1462_v16 = vpop.f32.mrf.mxu1 }
 0x1f4   :  { %v457_v23 = vadd.f32 %v1462_v16, %v346_v61  ;;  %1487 = vmatprep.mubr.bf16.mxu0 %v508_v12  ;;  %v496_v29 = vmax.f32 %v446_v22, 0.0 }
 0x1f5   :  { %v448_v25 = vpop.f32.mrf.mxu1  ;;  %1488 = vmatmul.mubr.bf16.vlgmr.msra.gmra.mxu0 %v509_v13 }
 0x1f6   :  { %v449_v26 = vadd.f32 %v448_v25, %v346_v61  ;;  %v499_v27 = vmax.f32 %v457_v23, 0.0  ;;  %1536 = vmatpush3.bf16.msra.mxu0 %v1641_v1 }
 0x1f7   :  { %v1465_v28 = vpop.f32.mrf.mxu1  ;;  %1537 = vmatprep.subr.bf16.mxu0 %v1642_v2 }
 0x1f8   :  { %v497_v30 = vmax.f32 %v449_v26, 0.0  ;;  %v511_v34 = vpack.c.bf16 %v499_v27, %v498_v31  ;;  %v470_v38 = vadd.f32 %v1465_v28, %v346_v61 }
 0x1f9   :  { %v461_v32 = vpop.f32.mrf.mxu1 }
 0x1fa   :  { %v510_v33 = vpack.c.bf16 %v497_v30, %v496_v29  ;;  %v462_v36 = vadd.f32 %v461_v32, %v346_v61  ;;  %v502_v45 = vmax.f32 %v470_v38, 0.0  ;;  %1538 = vmatpush3.bf16.msra.mxu0 %v1642_v2  ;;  %v1647_v38 = vld [vmem:[#allocation10 + $0x8] sm:$0xff]  }
 0x1fb   :  { %v1466_v35 = vpop.f32.mrf.mxu1  ;;  %1539 = vmatprep.subr.bf16.mxu0 %v1643_v3 }
 0x1fc   :  { %v473_v37 = vadd.f32 %v1466_v35, %v346_v61  ;;  %1491 = vmatprep.mubr.bf16.mxu0 %v510_v33  ;;  %v500_v43 = vmax.f32 %v462_v36, 0.0 }
 0x1fd   :  { %v464_v39 = vpop.f32.mrf.mxu1  ;;  %1492 = vmatmul.mubr.bf16.gmra.mxu0 %v511_v34 }
 0x1fe   :  { %v465_v40 = vadd.f32 %v464_v39, %v346_v61  ;;  %v503_v41 = vmax.f32 %v473_v37, 0.0  ;;  %1540 = vmatpush3.bf16.msra.mxu0 %v1643_v3  ;;  %v1646_v37 = vld [vmem:[#allocation10 + $0x10] sm:$0xff]   ;;  %v1648_v39 = vld [vmem:[#allocation10] sm:$0xff]  }
 0x1ff   :  { %v1469_v42 = vpop.f32.mrf.mxu1  ;;  %1541 = vmatprep.subr.bf16.mxu0 %v1644_v5 }
 0x200   :  { %v501_v44 = vmax.f32 %v465_v40, 0.0  ;;  %v513_v48 = vpack.c.bf16 %v503_v41, %v502_v45  ;;  %v486_v52 = vadd.f32 %v1469_v42, %v346_v61  ;;  %v687_v40 = vsub.s32 1, %v1878_v57 }
 0x201   :  { %v477_v46 = vpop.f32.mrf.mxu1 }
 0x202   :  { %v512_v47 = vpack.c.bf16 %v501_v44, %v500_v43  ;;  %v478_v50 = vadd.f32 %v477_v46, %v346_v61  ;;  %v506_v62 = vmax.f32 %v486_v52, 0.0  ;;  %1542 = vmatpush3.bf16.msra.mxu0 %v1644_v5  ;;  %v688_v42 = vrot.slane %v1884_v59, %v687_v40 }
 0x203   :  { %v1470_v49 = vpop.f32.mrf.mxu1 }
 0x204   :  { %v489_v51 = vadd.f32 %v1470_v49, %v346_v61  ;;  %1495 = vmatprep.mubr.bf16.mxu0 %v512_v47  ;;  %v504_v58 = vmax.f32 %v478_v50, 0.0 }
 0x205   :  { %v480_v53 = vpop.f32.mrf.mxu1  ;;  %1496 = vmatmul.mubr.bf16.gmra.mxu0 %v513_v48 }
 0x206   :  { %v481_v54 = vadd.f32 %v480_v53, %v346_v61  ;;  %v507_v55 = vmax.f32 %v489_v51, 0.0  ;;  %v1645_v61 = vld [vmem:[#allocation10 + $0x18] sm:$0xff]  }
 0x207   :  { %1543 = vmatprep.subr.bf16.mxu0 %v1645_v61 }
 0x208   :  { %v505_v60 = vmax.f32 %v481_v54, 0.0  ;;  %v515_v0 = vpack.c.bf16 %v507_v55, %v506_v62  ;;  %1544 = vmatpush3.bf16.msra.mxu0 %v1645_v61 }
 0x209   :  { %1545 = vmatprep.subr.bf16.mxu0 %v1646_v37 }
 0x20a   :  { %v514_v63 = vpack.c.bf16 %v505_v60, %v504_v58 }
 0x20c   :  { %1499 = vmatprep.mubr.bf16.mxu0 %v514_v63  ;;  %1546 = vmatpush3.bf16.msra.mxu0 %v1646_v37 }
 0x20d   :  { %1500 = vmatmul.mubr.bf16.gmra.mxu0 %v515_v0  ;;  %1547 = vmatprep.subr.bf16.mxu0 %v1647_v38 }
 0x210   :  { %1548 = vmatpush3.bf16.msra.mxu0 %v1647_v38 }
 0x211   :  { %1549 = vmatprep.subr.bf16.mxu0 %v1648_v39 }
 0x214   :  { %1550 = vmatpush3.bf16.msra.mxu0 %v1648_v39 }
 0x2b5   :  { %v1489_v6 = vpop.f32.mrf.mxu0 }
 0x2b7   :  { %v614_v7 = vpop.f32.mrf.mxu0 }
 0x2b9   :  { %v1490_v8 = vpop.f32.mrf.mxu0 }
 0x2ba   :  { %v678_v35 = vpack.c.bf16 %v1490_v8, %v1489_v6 }
 0x2bb   :  { %v617_v9 = vpop.f32.mrf.mxu0 }
 0x2bc   :  { %v677_v36 = vpack.c.bf16 %v617_v9, %v614_v7 }
 0x2bd   :  { %v1493_v10 = vpop.f32.mrf.mxu0 }
 0x2bf   :  { %v630_v11 = vpop.f32.mrf.mxu0 }
 0x2c1   :  { %v1494_v12 = vpop.f32.mrf.mxu0 }
 0x2c2   :  { %v680_v33 = vpack.c.bf16 %v1494_v12, %v1493_v10 }
 0x2c3   :  { %v633_v13 = vpop.f32.mrf.mxu0 }
 0x2c4   :  { %v679_v34 = vpack.c.bf16 %v633_v13, %v630_v11 }
 0x2c5   :  { %v1497_v16 = vpop.f32.mrf.mxu0 }
 0x2c7   :  { %v646_v22 = vpop.f32.mrf.mxu0 }
 0x2c9   :  { %v1498_v23 = vpop.f32.mrf.mxu0 }
 0x2ca   :  { %v682_v31 = vpack.c.bf16 %v1498_v23, %v1497_v16 }
 0x2cb   :  { %v649_v24 = vpop.f32.mrf.mxu0 }
 0x2cc   :  { %v681_v32 = vpack.c.bf16 %v649_v24, %v646_v22 }
 0x2cd   :  { %v1501_v25 = vpop.f32.mrf.mxu0 }
 0x2cf   :  { %v662_v26 = vpop.f32.mrf.mxu0 }
 0x2d1   :  { %v1502_v27 = vpop.f32.mrf.mxu0 }
 0x2d2   :  { %v684_v28 = vpack.c.bf16 %v1502_v27, %v1501_v25 }
 0x2d3   :  { %v665_v29 = vpop.f32.mrf.mxu0 }
 0x2d4   :  { %v683_v30 = vpack.c.bf16 %v665_v29, %v662_v26  ;;  %1503 = vmatprep.subr.bf16.mxu1 %v684_v28 }
 0x2d5   :  { %1504 = vmatpush3.bf16.msra.mxu1 %v684_v28 }
 0x2d6   :  { %1505 = vmatprep.subr.bf16.mxu1 %v683_v30 }
 0x2d9   :  { %1506 = vmatpush3.bf16.msra.mxu1 %v683_v30 }
 0x2da   :  { %1507 = vmatprep.subr.bf16.mxu1 %v682_v31 }
 0x2dd   :  { %1508 = vmatpush3.bf16.msra.mxu1 %v682_v31 }
 0x2de   :  { %1509 = vmatprep.subr.bf16.mxu1 %v681_v32 }
 0x2e1   :  { %1510 = vmatpush3.bf16.msra.mxu1 %v681_v32 }
 0x2e2   :  { %1511 = vmatprep.subr.bf16.mxu1 %v680_v33 }
 0x2e5   :  { %1512 = vmatpush3.bf16.msra.mxu1 %v680_v33 }
 0x2e6   :  { %1513 = vmatprep.subr.bf16.mxu1 %v679_v34 }
 0x2e9   :  { %1514 = vmatpush3.bf16.msra.mxu1 %v679_v34 }
 0x2ea   :  { %1515 = vmatprep.subr.bf16.mxu1 %v678_v35 }
 0x2ed   :  { %1516 = vmatpush3.bf16.msra.mxu1 %v678_v35 }
 0x2ee   :  { %1517 = vmatprep.subr.bf16.mxu1 %v677_v36 }
 0x2f1   :  { %1518 = vmatpush3.bf16.msra.mxu1 %v677_v36 }
 0x2f4   :  { %1520 = vmatmul.mubr.bf16.vlgmr.msra.gmra.mxu1 %v1855_v14 }
 0x2f5   :  { %1523 = vmatprep.mubr.bf16.mxu1 %v1857_v15 }
 0x2fc   :  { %1524 = vmatmul.mubr.bf16.gmra.mxu1 %v1861_v17 }
 0x2fd   :  { %1527 = vmatprep.mubr.bf16.mxu1 %v1863_v18 }
 0x304   :  { %1528 = vmatmul.mubr.bf16.gmra.mxu1 %v1867_v19 }
 0x305   :  { %1531 = vmatprep.mubr.bf16.mxu1 %v1869_v20 }
 0x30c   :  { %1532 = vmatmul.mubr.bf16.gmra.mxu1 %v1873_v21 }
 0x30d   :  { %1583 = vmatprep.mubr.bf16.mxu1 %v1852_v4 }
 0x3b4   :  { %v1521_v41 = vpop.f32.mrf.mxu1 }
 0x3b5   :  { %v732_v47 = vadd.f32 %v1521_v41, %v688_v42 }
 0x3b6   :  { %v723_v43 = vpop.f32.mrf.mxu1 }
 0x3b7   :  { %v724_v45 = vadd.f32 %v723_v43, %v688_v42  ;;  %v788_v53 = vmax.f32 %v732_v47, 0.0 }
 0x3b8   :  { %v1522_v44 = vpop.f32.mrf.mxu1 }
 0x3b9   :  { %v735_v46 = vadd.f32 %v1522_v44, %v688_v42  ;;  %v786_v51 = vmax.f32 %v724_v45, 0.0 }
 0x3ba   :  { %v726_v4 = vpop.f32.mrf.mxu1 }
 0x3bb   :  { %v727_v48 = vadd.f32 %v726_v4, %v688_v42  ;;  %v789_v49 = vmax.f32 %v735_v46, 0.0 }
 0x3bc   :  { %v1525_v50 = vpop.f32.mrf.mxu1 }
 0x3bd   :  { %v787_v52 = vmax.f32 %v727_v48, 0.0  ;;  %v803_v58 = vpack.c.bf16 %v789_v49, %v788_v53  ;;  %v748_v0 = vadd.f32 %v1525_v50, %v688_v42 }
 0x3be   :  { %v739_v54 = vpop.f32.mrf.mxu1 }
 0x3bf   :  { %v802_v55 = vpack.c.bf16 %v787_v52, %v786_v51  ;;  %v740_v62 = vadd.f32 %v739_v54, %v688_v42  ;;  %v792_v7 = vmax.f32 %v748_v0, 0.0 }
 0x3c0   :  { %v1526_v60 = vpop.f32.mrf.mxu1 }
 0x3c1   :  { %v751_v63 = vadd.f32 %v1526_v60, %v688_v42  ;;  %1551 = vmatprep.mubr.bf16.mxu0 %v802_v55  ;;  %v790_v61 = vmax.f32 %v740_v62, 0.0 }
 0x3c2   :  { %v742_v1 = vpop.f32.mrf.mxu1  ;;  %1552 = vmatmul.mubr.bf16.vlgmr.msra.gmra.mxu0 %v803_v58 }
 0x3c3   :  { %v743_v2 = vadd.f32 %v742_v1, %v688_v42  ;;  %v793_v3 = vmax.f32 %v751_v63, 0.0 }
 0x3c4   :  { %v1529_v5 = vpop.f32.mrf.mxu1 }
 0x3c5   :  { %v791_v6 = vmax.f32 %v743_v2, 0.0  ;;  %v805_v10 = vpack.c.bf16 %v793_v3, %v792_v7  ;;  %v764_v16 = vadd.f32 %v1529_v5, %v688_v42  ;;  %v981_v7 = vsub.s32 2, %v1878_v57 }
 0x3c6   :  { %v755_v8 = vpop.f32.mrf.mxu1 }
 0x3c7   :  { %v804_v9 = vpack.c.bf16 %v791_v6, %v790_v61  ;;  %v756_v12 = vadd.f32 %v755_v8, %v688_v42  ;;  %v796_v28 = vmax.f32 %v764_v16, 0.0  ;;  %v1906_v8 = vrot.slane %v1884_v59, %v981_v7 }
 0x3c8   :  { %v1530_v11 = vpop.f32.mrf.mxu1 }
 0x3c9   :  { %v767_v13 = vadd.f32 %v1530_v11, %v688_v42  ;;  %1555 = vmatprep.mubr.bf16.mxu0 %v804_v9  ;;  %v794_v26 = vmax.f32 %v756_v12, 0.0  ;;  %v1150_v9 = vsub.s32 4, %v1878_v57 }
 0x3ca   :  { %v758_v22 = vpop.f32.mrf.mxu1  ;;  %1556 = vmatmul.mubr.bf16.gmra.mxu0 %v805_v10 }
 0x3cb   :  { %v759_v23 = vadd.f32 %v758_v22, %v688_v42  ;;  %v797_v24 = vmax.f32 %v767_v13, 0.0 }
 0x3cc   :  { %v1533_v25 = vpop.f32.mrf.mxu1 }
 0x3cd   :  { %v795_v27 = vmax.f32 %v759_v23, 0.0  ;;  %v807_v31 = vpack.c.bf16 %v797_v24, %v796_v28  ;;  %v780_v35 = vadd.f32 %v1533_v25, %v688_v42 }
 0x3ce   :  { %v771_v29 = vpop.f32.mrf.mxu1 }
 0x3cf   :  { %v806_v30 = vpack.c.bf16 %v795_v27, %v794_v26  ;;  %v772_v33 = vadd.f32 %v771_v29, %v688_v42  ;;  %v800_v41 = vmax.f32 %v780_v35, 0.0 }
 0x3d0   :  { %v1534_v32 = vpop.f32.mrf.mxu1 }
 0x3d1   :  { %v783_v34 = vadd.f32 %v1534_v32, %v688_v42  ;;  %1559 = vmatprep.mubr.bf16.mxu0 %v806_v30  ;;  %v798_v39 = vmax.f32 %v772_v33, 0.0 }
 0x3d2   :  { %v774_v36 = vpop.f32.mrf.mxu1  ;;  %1560 = vmatmul.mubr.bf16.gmra.mxu0 %v807_v31 }
 0x3d3   :  { %v775_v37 = vadd.f32 %v774_v36, %v688_v42  ;;  %v801_v38 = vmax.f32 %v783_v34, 0.0 }
 0x3d5   :  { %v799_v40 = vmax.f32 %v775_v37, 0.0  ;;  %v809_v44 = vpack.c.bf16 %v801_v38, %v800_v41 }
 0x3d7   :  { %v808_v43 = vpack.c.bf16 %v799_v40, %v798_v39 }
 0x3d9   :  { %1563 = vmatprep.mubr.bf16.mxu0 %v808_v43 }
 0x3da   :  { %1564 = vmatmul.mubr.bf16.gmra.mxu0 %v809_v44 }
 0x482   :  { %v1553_v45 = vpop.f32.mrf.mxu0 }
 0x484   :  { %v908_v46 = vpop.f32.mrf.mxu0 }
 0x486   :  { %v1554_v47 = vpop.f32.mrf.mxu0 }
 0x487   :  { %v972_v61 = vpack.c.bf16 %v1554_v47, %v1553_v45 }
 0x488   :  { %v911_v4 = vpop.f32.mrf.mxu0 }
 0x489   :  { %v971_v6 = vpack.c.bf16 %v911_v4, %v908_v46 }
 0x48a   :  { %v1557_v48 = vpop.f32.mrf.mxu0 }
 0x48c   :  { %v924_v49 = vpop.f32.mrf.mxu0 }
 0x48e   :  { %v1558_v50 = vpop.f32.mrf.mxu0 }
 0x48f   :  { %v974_v3 = vpack.c.bf16 %v1558_v50, %v1557_v48 }
 0x490   :  { %v927_v51 = vpop.f32.mrf.mxu0 }
 0x491   :  { %v973_v5 = vpack.c.bf16 %v927_v51, %v924_v49 }
 0x492   :  { %v1561_v52 = vpop.f32.mrf.mxu0 }
 0x494   :  { %v940_v53 = vpop.f32.mrf.mxu0 }
 0x496   :  { %v1562_v54 = vpop.f32.mrf.mxu0 }
 0x497   :  { %v976_v1 = vpack.c.bf16 %v1562_v54, %v1561_v52 }
 0x498   :  { %v943_v42 = vpop.f32.mrf.mxu0 }
 0x499   :  { %v975_v2 = vpack.c.bf16 %v943_v42, %v940_v53 }
 0x49a   :  { %v1565_v55 = vpop.f32.mrf.mxu0 }
 0x49c   :  { %v956_v58 = vpop.f32.mrf.mxu0 }
 0x49e   :  { %v1566_v60 = vpop.f32.mrf.mxu0 }
 0x49f   :  { %v978_v62 = vpack.c.bf16 %v1566_v60, %v1565_v55 }
 0x4a0   :  { %v959_v63 = vpop.f32.mrf.mxu0 }
 0x4a1   :  { %v977_v0 = vpack.c.bf16 %v959_v63, %v956_v58  ;;  %1567 = vmatprep.subr.bf16.mxu1 %v978_v62 }
 0x4a2   :  { %1568 = vmatpush3.bf16.msra.mxu1 %v978_v62 }
 0x4a3   :  { %1569 = vmatprep.subr.bf16.mxu1 %v977_v0 }
 0x4a6   :  { %1570 = vmatpush3.bf16.msra.mxu1 %v977_v0 }
 0x4a7   :  { %1571 = vmatprep.subr.bf16.mxu1 %v976_v1 }
 0x4aa   :  { %1572 = vmatpush3.bf16.msra.mxu1 %v976_v1 }
 0x4ab   :  { %1573 = vmatprep.subr.bf16.mxu1 %v975_v2 }
 0x4ae   :  { %1574 = vmatpush3.bf16.msra.mxu1 %v975_v2 }
 0x4af   :  { %1575 = vmatprep.subr.bf16.mxu1 %v974_v3 }
 0x4b2   :  { %1576 = vmatpush3.bf16.msra.mxu1 %v974_v3 }
 0x4b3   :  { %1577 = vmatprep.subr.bf16.mxu1 %v973_v5 }
 0x4b6   :  { %1578 = vmatpush3.bf16.msra.mxu1 %v973_v5 }
 0x4b7   :  { %1579 = vmatprep.subr.bf16.mxu1 %v972_v61 }
 0x4ba   :  { %1580 = vmatpush3.bf16.msra.mxu1 %v972_v61 }
 0x4bb   :  { %1581 = vmatprep.subr.bf16.mxu1 %v971_v6 }
 0x4be   :  { %1582 = vmatpush3.bf16.msra.mxu1 %v971_v6 }
 0x4c1   :  { %1584 = vmatmul.mubr.bf16.vlgmr.msra.gmra.mxu1 %v1855_v14  ;;  %v1098_v14 = vsub.s32 3, %v1878_v57 }
 0x4c2   :  { %1587 = vmatprep.mubr.bf16.mxu1 %v1857_v15 }
 0x4c9   :  { %1588 = vmatmul.mubr.bf16.gmra.mxu1 %v1861_v17 }
 0x4ca   :  { %1591 = vmatprep.mubr.bf16.mxu1 %v1863_v18  ;;  %v1912_v18 = vrot.slane %v1884_v59, %v1150_v9 }
 0x4d1   :  { %1592 = vmatmul.mubr.bf16.gmra.mxu1 %v1867_v19  ;;  %v1915_v19 = vrot.slane %v1884_v59, %v1098_v14 }
 0x4d2   :  { %1595 = vmatprep.mubr.bf16.mxu1 %v1869_v20 }
 0x4d9   :  { %1596 = vmatmul.mubr.bf16.gmra.mxu1 %v1873_v21 }
 0x581   :  { %v1585_v15 = vpop.f32.mrf.mxu1 }
 0x582   :  { %v1026_v17 = vadd.f32 %v1585_v15, %v1906_v8 }
 0x583   :  { %v1017_v20 = vpop.f32.mrf.mxu1 }
 0x584   :  { %v1082_v21 = vmax.f32 %v1026_v17, 0.0  ;;  %v1018_v10 = vadd.f32 %v1017_v20, %v1906_v8 }
 0x585   :  { %v1586_v11 = vpop.f32.mrf.mxu1 }
 0x586   :  { %v1080_v12 = vmax.f32 %v1018_v10, 0.0  ;;  %v1029_v13 = vadd.f32 %v1586_v11, %v1906_v8  ;;  %v1154_v16 = vmul.f32 %v1912_v18, %v1082_v21  ;;  %v1102_v57 = vmul.f32 %v1915_v19, %v1082_v21 }
 0x587   :  { %v1020_v22 = vpop.f32.mrf.mxu1 }
 0x588   :  { %v1083_v23 = vmax.f32 %v1029_v13, 0.0  ;;  %1172 = vadd.xlane.f32.xlu1 %v1154_v16  ;;  %1120 = vadd.xlane.f32.xlu0 %v1102_v57  ;;  %v1021_v59 = vadd.f32 %v1020_v22, %v1906_v8  ;;  %v1152_v26 = vmul.f32 %v1912_v18, %v1080_v12  ;;  %v1100_v29 = vmul.f32 %v1915_v19, %v1080_v12 }
 0x589   :  { %v1589_v24 = vpop.f32.mrf.mxu1 }
 0x58a   :  { %v1155_v25 = vmul.f32 %v1912_v18, %v1083_v23  ;;  %v1081_v30 = vmax.f32 %v1021_v59, 0.0  ;;  %v1042_v31 = vadd.f32 %v1589_v24, %v1906_v8  ;;  %v1103_v33 = vmul.f32 %v1915_v19, %v1083_v23 }
 0x58b   :  { %v1033_v27 = vpop.f32.mrf.mxu1 }
 0x58c   :  { %1174 = vadd.xlane.f32.xlu1 %v1155_v25  ;;  %1168 = vadd.xlane.f32.xlu0 %v1152_v26  ;;  %v1086_v34 = vmax.f32 %v1042_v31, 0.0  ;;  %v1101_v36 = vmul.f32 %v1915_v19, %v1081_v30  ;;  %v1153_v37 = vmul.f32 %v1912_v18, %v1081_v30  ;;  %v1034_v40 = vadd.f32 %v1033_v27, %v1906_v8 }
 0x58d   :  { %v1590_v28 = vpop.f32.mrf.mxu1  ;;  %v1965_v30 = vand.u32 127, %v343_v56 }
 0x58e   :  { %v1045_v32 = vadd.f32 %v1590_v28, %v1906_v8  ;;  %v1158_v44 = vmul.f32 %v1912_v18, %v1086_v34  ;;  %v1084_v46 = vmax.f32 %v1034_v40, 0.0  ;;  %v1106_v48 = vmul.f32 %v1915_v19, %v1086_v34 }
 0x58f   :  { %v1036_v38 = vpop.f32.mrf.mxu1  ;;  %vm1203_vm0 = vcmp.eq.s32.totalorder %v1965_v30, 1  ;;  %vm1202_vm1 = vcmp.eq.s32.totalorder %v1965_v30, 0 }
 0x590   :  { %1122 = vadd.xlane.f32.xlu1 %v1103_v33  ;;  %1116 = vadd.xlane.f32.xlu0 %v1100_v29  ;;  %v1087_v35 = vmax.f32 %v1045_v32, 0.0  ;;  %v1037_v41 = vadd.f32 %v1036_v38, %v1906_v8  ;;  %v1156_v53 = vmul.f32 %v1912_v18, %v1084_v46  ;;  %v1104_v60 = vmul.f32 %v1915_v19, %v1084_v46 }
 0x591   :  { %v1593_v39 = vpop.f32.mrf.mxu1 }
 0x592   :  { %v1159_v43 = vmul.f32 %v1912_v18, %v1087_v35  ;;  %v1085_v47 = vmax.f32 %v1037_v41, 0.0  ;;  %v1107_v4 = vmul.f32 %v1915_v19, %v1087_v35  ;;  %v1058_v50 = vadd.f32 %v1593_v39, %v1906_v8 }
 0x593   :  { %v1049_v45 = vpop.f32.mrf.mxu1 }
 0x594   :  { %1118 = vadd.xlane.f32.xlu1 %v1101_v36  ;;  %1170 = vadd.xlane.f32.xlu0 %v1153_v37  ;;  %v1157_v52 = vmul.f32 %v1912_v18, %v1085_v47  ;;  %v1090_v42 = vmax.f32 %v1058_v50, 0.0  ;;  %v1105_v58 = vmul.f32 %v1915_v19, %v1085_v47  ;;  %v1050_v63 = vadd.f32 %v1049_v45, %v1906_v8 }
 0x595   :  { %v1594_v49 = vpop.f32.mrf.mxu1 }
 0x596   :  { %v1061_v51 = vadd.f32 %v1594_v49, %v1906_v8  ;;  %v1162_v2 = vmul.f32 %v1912_v18, %v1090_v42  ;;  %v1088_v5 = vmax.f32 %v1050_v63, 0.0  ;;  %v1110_v7 = vmul.f32 %v1915_v19, %v1090_v42 }
 0x597   :  { %v1052_v54 = vpop.f32.mrf.mxu1 }
 0x598   :  { %1182 = vadd.xlane.f32.xlu1 %v1159_v43  ;;  %1180 = vadd.xlane.f32.xlu0 %v1158_v44  ;;  %v1091_v55 = vmax.f32 %v1061_v51, 0.0  ;;  %v1053_v0 = vadd.f32 %v1052_v54, %v1906_v8  ;;  %v1160_v20 = vmul.f32 %v1912_v18, %v1088_v5  ;;  %v1108_v11 = vmul.f32 %v1915_v19, %v1088_v5 }
 0x599   :  { %v1597_v62 = vpop.f32.mrf.mxu1 }
 0x59a   :  { %v1163_v1 = vmul.f32 %v1912_v18, %v1091_v55  ;;  %v1089_v61 = vmax.f32 %v1053_v0, 0.0  ;;  %v1111_v6 = vmul.f32 %v1915_v19, %v1091_v55  ;;  %v1074_v14 = vadd.f32 %v1597_v62, %v1906_v8 }
 0x59b   :  { %v1065_v3 = vpop.f32.mrf.mxu1 }
 0x59c   :  { %1130 = vadd.xlane.f32.xlu1 %v1107_v4  ;;  %1128 = vadd.xlane.f32.xlu0 %v1106_v48  ;;  %v1161_v17 = vmul.f32 %v1912_v18, %v1089_v61  ;;  %v1094_v10 = vmax.f32 %v1074_v14, 0.0  ;;  %v1066_v12 = vadd.f32 %v1065_v3, %v1906_v8  ;;  %v1109_v57 = vmul.f32 %v1915_v19, %v1089_v61 }
 0x59d   :  { %v1598_v9 = vpop.f32.mrf.mxu1 }
 0x59e   :  { %v1077_v15 = vadd.f32 %v1598_v9, %v1906_v8  ;;  %v1092_v22 = vmax.f32 %v1066_v12, 0.0  ;;  %v1166_v59 = vmul.f32 %v1912_v18, %v1094_v10  ;;  %v1114_v29 = vmul.f32 %v1915_v19, %v1094_v10 }
 0x59f   :  { %v1068_v21 = vpop.f32.mrf.mxu1 }
 0x5a0   :  { %1178 = vadd.xlane.f32.xlu1 %v1157_v52  ;;  %1176 = vadd.xlane.f32.xlu0 %v1156_v53  ;;  %v1095_v13 = vmax.f32 %v1077_v15, 0.0  ;;  %v1069_v16 = vadd.f32 %v1068_v21, %v1906_v8  ;;  %v1164_v26 = vmul.f32 %v1912_v18, %v1092_v22  ;;  %v1112_v27 = vmul.f32 %v1915_v19, %v1092_v22 }
 0x5a2   :  { %v1093_v23 = vmax.f32 %v1069_v16, 0.0  ;;  %v1167_v24 = vmul.f32 %v1912_v18, %v1095_v13  ;;  %v1115_v28 = vmul.f32 %v1915_v19, %v1095_v13 }
 0x5a4   :  { %1126 = vadd.xlane.f32.xlu1 %v1105_v58  ;;  %1124 = vadd.xlane.f32.xlu0 %v1104_v60  ;;  %v1165_v25 = vmul.f32 %v1912_v18, %v1093_v23  ;;  %v1113_v8 = vmul.f32 %v1915_v19, %v1093_v23 }
 0x5a8   :  { %1190 = vadd.xlane.f32.xlu1 %v1163_v1  ;;  %1188 = vadd.xlane.f32.xlu0 %v1162_v2 }
 0x5ac   :  { %1138 = vadd.xlane.f32.xlu1 %v1111_v6  ;;  %1136 = vadd.xlane.f32.xlu0 %v1110_v7 }
 0x5b0   :  { %1186 = vadd.xlane.f32.xlu1 %v1161_v17  ;;  %1184 = vadd.xlane.f32.xlu0 %v1160_v20 }
 0x5b4   :  { %1134 = vadd.xlane.f32.xlu1 %v1109_v57  ;;  %1132 = vadd.xlane.f32.xlu0 %v1108_v11 }
 0x5b8   :  { %1198 = vadd.xlane.f32.xlu1 %v1167_v24  ;;  %1196 = vadd.xlane.f32.xlu0 %v1166_v59 }
 0x5bc   :  { %1194 = vadd.xlane.f32.xlu1 %v1165_v25  ;;  %1192 = vadd.xlane.f32.xlu0 %v1164_v26 }
 0x5c0   :  { %1142 = vadd.xlane.f32.xlu1 %v1113_v8  ;;  %1140 = vadd.xlane.f32.xlu0 %v1112_v27 }
 0x5c4   :  { %1146 = vadd.xlane.f32.xlu1 %v1115_v28  ;;  %1144 = vadd.xlane.f32.xlu0 %v1114_v29 }
 0x611   :  { %v1173_v18 = vpop.xlane.xlu1 %1172  ;;  %v1121_v31 = vpop.xlane.xlu0 %1120 }
 0x612   :  { %v1206_v32 = vsel %vm1203_vm0, %v1173_v18, 0.0 }
 0x613   :  { %v1222_v33 = vsel %vm1202_vm1, %v1121_v31, %v1206_v32 }
 0x614   :  { %1238 = vst [vmem:[#allocation11 + $0x10] sm:$0xff] %v1222_v33 }
 0x615   :  { %v1175_v34 = vpop.xlane.xlu1 %1174  ;;  %v1169_v19 = vpop.xlane.xlu0 %1168 }
 0x616   :  { %v1207_v35 = vsel %vm1203_vm0, %v1175_v34, 0.0  ;;  %v1204_v56 = vsel %vm1203_vm0, %v1169_v19, 0.0 }
 0x619   :  { %v1123_v36 = vpop.xlane.xlu1 %1122  ;;  %v1117_v37 = vpop.xlane.xlu0 %1116 }
 0x61a   :  { %v1223_v38 = vsel %vm1202_vm1, %v1123_v36, %v1207_v35  ;;  %v1220_v39 = vsel %vm1202_vm1, %v1117_v37, %v1204_v56 }
 0x61b   :  { %1239 = vst [vmem:[#allocation11 + $0x18] sm:$0xff] %v1223_v38  ;;  %1236 = vst [vmem:[#allocation11] sm:$0xff] %v1220_v39 }
 0x61d   :  { %v1119_v40 = vpop.xlane.xlu1 %1118  ;;  %v1171_v41 = vpop.xlane.xlu0 %1170 }
 0x61e   :  { %v1205_v43 = vsel %vm1203_vm0, %v1171_v41, 0.0 }
 0x61f   :  { %v1221_v44 = vsel %vm1202_vm1, %v1119_v40, %v1205_v43 }
 0x620   :  { %1237 = vst [vmem:[#allocation11 + $0x8] sm:$0xff] %v1221_v44 }
 0x621   :  { %v1183_v45 = vpop.xlane.xlu1 %1182  ;;  %v1181_v46 = vpop.xlane.xlu0 %1180 }
 0x622   :  { %v1211_v47 = vsel %vm1203_vm0, %v1183_v45, 0.0  ;;  %v1210_v4 = vsel %vm1203_vm0, %v1181_v46, 0.0 }
 0x625   :  { %v1131_v48 = vpop.xlane.xlu1 %1130  ;;  %v1129_v49 = vpop.xlane.xlu0 %1128 }
 0x626   :  { %v1227_v50 = vsel %vm1202_vm1, %v1131_v48, %v1211_v47  ;;  %v1226_v51 = vsel %vm1202_vm1, %v1129_v49, %v1210_v4 }
 0x627   :  { %1243 = vst [vmem:[#allocation11 + $0x38] sm:$0xff] %v1227_v50  ;;  %1242 = vst [vmem:[#allocation11 + $0x30] sm:$0xff] %v1226_v51 }
 0x629   :  { %v1179_v52 = vpop.xlane.xlu1 %1178  ;;  %v1177_v53 = vpop.xlane.xlu0 %1176 }
 0x62a   :  { %v1209_v54 = vsel %vm1203_vm0, %v1179_v52, 0.0  ;;  %v1208_v42 = vsel %vm1203_vm0, %v1177_v53, 0.0 }
 0x62d   :  { %v1127_v55 = vpop.xlane.xlu1 %1126  ;;  %v1125_v58 = vpop.xlane.xlu0 %1124 }
 0x62e   :  { %v1225_v60 = vsel %vm1202_vm1, %v1127_v55, %v1209_v54  ;;  %v1224_v62 = vsel %vm1202_vm1, %v1125_v58, %v1208_v42 }
 0x62f   :  { %1241 = vst [vmem:[#allocation11 + $0x28] sm:$0xff] %v1225_v60  ;;  %1240 = vst [vmem:[#allocation11 + $0x20] sm:$0xff] %v1224_v62 }
 0x631   :  { %v1191_v63 = vpop.xlane.xlu1 %1190  ;;  %v1189_v0 = vpop.xlane.xlu0 %1188 }
 0x632   :  { %v1215_v1 = vsel %vm1203_vm0, %v1191_v63, 0.0  ;;  %v1214_v2 = vsel %vm1203_vm0, %v1189_v0, 0.0 }
 0x635   :  { %v1139_v3 = vpop.xlane.xlu1 %1138  ;;  %v1137_v5 = vpop.xlane.xlu0 %1136 }
 0x636   :  { %v1231_v61 = vsel %vm1202_vm1, %v1139_v3, %v1215_v1  ;;  %v1230_v6 = vsel %vm1202_vm1, %v1137_v5, %v1214_v2 }
 0x637   :  { %1247 = vst [vmem:[#allocation11 + $0x58] sm:$0xff] %v1231_v61  ;;  %1246 = vst [vmem:[#allocation11 + $0x50] sm:$0xff] %v1230_v6 }
 0x639   :  { %v1187_v7 = vpop.xlane.xlu1 %1186  ;;  %v1185_v9 = vpop.xlane.xlu0 %1184 }
 0x63a   :  { %v1213_v14 = vsel %vm1203_vm0, %v1187_v7, 0.0  ;;  %v1212_v15 = vsel %vm1203_vm0, %v1185_v9, 0.0 }
 0x63d   :  { %v1135_v17 = vpop.xlane.xlu1 %1134  ;;  %v1133_v20 = vpop.xlane.xlu0 %1132 }
 0x63e   :  { %v1229_v21 = vsel %vm1202_vm1, %v1135_v17, %v1213_v14  ;;  %v1228_v10 = vsel %vm1202_vm1, %v1133_v20, %v1212_v15 }
 0x63f   :  { %1245 = vst [vmem:[#allocation11 + $0x48] sm:$0xff] %v1229_v21  ;;  %1244 = vst [vmem:[#allocation11 + $0x40] sm:$0xff] %v1228_v10 }
 0x641   :  { %v1199_v11 = vpop.xlane.xlu1 %1198  ;;  %v1197_v12 = vpop.xlane.xlu0 %1196 }
 0x642   :  { %v1219_v26 = vsel %vm1203_vm0, %v1199_v11, 0.0  ;;  %v1218_v8 = vsel %vm1203_vm0, %v1197_v12, 0.0 }
 0x645   :  { %v1195_v13 = vpop.xlane.xlu1 %1194  ;;  %v1193_v16 = vpop.xlane.xlu0 %1192 }
 0x646   :  { %v1217_v57 = vsel %vm1203_vm0, %v1195_v13, 0.0  ;;  %v1216_v22 = vsel %vm1203_vm0, %v1193_v16, 0.0 }
 0x649   :  { %v1143_v23 = vpop.xlane.xlu1 %1142  ;;  %v1141_v24 = vpop.xlane.xlu0 %1140 }
 0x64a   :  { %v1233_v59 = vsel %vm1202_vm1, %v1143_v23, %v1217_v57  ;;  %v1232_v25 = vsel %vm1202_vm1, %v1141_v24, %v1216_v22 }
 0x64b   :  { %1249 = vst [vmem:[#allocation11 + $0x68] sm:$0xff] %v1233_v59  ;;  %1248 = vst [vmem:[#allocation11 + $0x60] sm:$0xff] %v1232_v25 }
 0x64d   :  { %v1147_v27 = vpop.xlane.xlu1 %1146  ;;  %v1145_v28 = vpop.xlane.xlu0 %1144 }
 0x64e   :  { %v1235_v29 = vsel %vm1202_vm1, %v1147_v27, %v1219_v26  ;;  %v1234_v18 = vsel %vm1202_vm1, %v1145_v28, %v1218_v8 }
 0x64f   :  { %1251 = vst [vmem:[#allocation11 + $0x78] sm:$0xff] %v1235_v29  ;;  %1250 = vst [vmem:[#allocation11 + $0x70] sm:$0xff] %v1234_v18 }
 0x650   :  { %1760 = shalt.err (!%p1757_p1)
}
 0x651   :  { %s1785_s23 = smov 128   ;;  %s1786_s24 = smov 8  }
 0x652   :  { %1263 = dma.vmem_to_hbm [thread:$0]  %s1258_s21, 2048, %s2042_s6, [#allocation4], %s1785_s23, %s1785_s23, %s1786_s24  }
 0x653   :  { %1775 = dma.done.wait [#allocation4], 2048  }
 0x654   :  { %1776 = vsyncadd [#allocation4], 4294965248 }
 0x655   :  { %1267 = vsyncpa [#allocation3], 1 }
 0x656   :  { %1268 = vsyncpa [#allocation6], 1 }
 0x657   :  { %1269 = vsyncpa [#allocation9], 1 }
 0x658   :  { %1270 = vsyncpa [#allocation4], 1 }

</bundles_post_ra>
